<compile_context>
chip_gen: v7x
topology: tpu7x:2x2x1
jax: 0.10.0
libtpu: 0.0.40
codegen_flags: <defaults>
</compile_context>

<pallas_src>
import jax
import jax.numpy as jnp
from jax.experimental import pallas as pl
from jax.experimental.pallas import tpu as pltpu


def _bias_layer_kernel(x_ref, range_ref, ab_ref, o_ref):
    low = range_ref[0]           # SMEM scalar int32
    high = range_ref[1]          # SMEM scalar int32
    alpha = ab_ref[0]            # SMEM scalar f32
    beta = ab_ref[1]             # SMEM scalar f32

    x = x_ref[...]
    col = jax.lax.broadcasted_iota(jnp.int32, x.shape, dimension=1)
    in_range = (col >= low) & (col < high)
    biased = alpha * x.astype(jnp.float32) + beta
    o_ref[...] = jnp.where(in_range, biased, x.astype(jnp.float32)).astype(o_ref.dtype)


def _pick_row_tile(B, C, itemsize, vmem_budget_bytes=8 * 1024 * 1024):
    """Largest 8-aligned row tile that (a) divides B and (b) keeps the
    double-buffered in+out tiles comfortably inside the scoped VMEM budget.
    Falls back to the full batch (always legal: full-extent block)."""
    # bytes per row for input tile + output tile, each double-buffered.
    bytes_per_row = 4 * C * itemsize
    max_rows = max(8, vmem_budget_bytes // max(bytes_per_row, 1))
    if B <= max_rows:
        return B
    tm = (max_rows // 8) * 8
    while tm >= 8:
        if B % tm == 0:
            return tm
        tm -= 8
    return B  # no aligned divisor -> single full block


def bias_layer_forward(x, alpha, beta, low_range, high_range):
    """Pallas BiasLayer.forward.

    x: (B, C) float logits
    alpha, beta: shape-(1,) parameters (nn.Parameter equivalents)
    low_range, high_range: column range (Python ints or traced int scalars)
    """
    B, C = x.shape
    tm = _pick_row_tile(B, C, x.dtype.itemsize)
    grid = (B // tm,) if B % tm == 0 else (1,)
    if grid == (1,):
        tm = B

    ranges = jnp.stack([jnp.asarray(low_range, jnp.int32),
                        jnp.asarray(high_range, jnp.int32)])
    ab = jnp.stack([jnp.asarray(alpha, jnp.float32).reshape(()),
                    jnp.asarray(beta, jnp.float32).reshape(())])

    return pl.pallas_call(
        _bias_layer_kernel,
        out_shape=jax.ShapeDtypeStruct((B, C), x.dtype),
        grid=grid,
        in_specs=[
            pl.BlockSpec((tm, C), lambda i: (i, 0)),                 # data tile in VMEM
            pl.BlockSpec(memory_space=pltpu.MemorySpace.SMEM),       # (low, high)
            pl.BlockSpec(memory_space=pltpu.MemorySpace.SMEM),       # (alpha, beta)
        ],
        out_specs=pl.BlockSpec((tm, C), lambda i: (i, 0)),
        compiler_params=pltpu.CompilerParams(
            dimension_semantics=("parallel",),
        ),
        cost_estimate=pl.CostEstimate(
            flops=2 * B * C,
            transcendentals=0,
            bytes_accessed=2 * B * C * x.dtype.itemsize + 16,
        ),
    )(x, ranges, ab)


def _reference(x, alpha, beta, low, high):
    col = jnp.arange(x.shape[1])
    m = (col >= low) & (col < high)
    return jnp.where(m[None, :], alpha[0] * x + beta[0], x)


if __name__ == "__main__":
    key = jax.random.PRNGKey(0)
    B, C = 8, 128                      # batch=8, num_classes=128 (lane-dense output)
    low, high = 64, 128                # bias-correct the "new task" logit range

    x = jax.random.normal(key, (B, C), jnp.float32)

    # Module defaults: alpha=1, beta=0 (identity inside the range).
    alpha0 = jnp.ones((1,), jnp.float32)
    beta0 = jnp.zeros((1,), jnp.float32)
    # Non-trivial parameters to exercise the affine path.
    alpha1 = jnp.full((1,), 1.5, jnp.float32)
    beta1 = jnp.full((1,), -0.25, jnp.float32)

    fwd = jax.jit(bias_layer_forward, static_argnums=())

    out0 = jax.block_until_ready(fwd(x, alpha0, beta0, low, high))
    out1 = jax.block_until_ready(fwd(x, alpha1, beta1, low, high))
    # Same compiled kernel, different (dynamic) range.
    out2 = jax.block_until_ready(fwd(x, alpha1, beta1, 0, 32))

    assert out0.shape == (B, C)
    assert out1.shape == (B, C)
    assert jnp.allclose(out0, _reference(x, alpha0, beta0, low, high), atol=1e-6)
    assert jnp.allclose(out1, _reference(x, alpha1, beta1, low, high), atol=1e-6)
    assert jnp.allclose(out2, _reference(x, alpha1, beta1, 0, 32), atol=1e-6)
    # Columns outside [low, high) must be untouched copies of x.
    assert jnp.array_equal(out1[:, :low], x[:, :low])
    assert jnp.array_equal(out2[:, 32:], x[:, 32:])

    print("KERNEL_OK")
</pallas_src>

<mosaic_0001>
module attributes {stable_mosaic.version = 11 : i64} {
  func.func @_bias_layer_kernel(%arg0: i32, %arg1: memref<8x128xf32, #tpu.memory_space<vmem>>, %arg2: memref<2xi32, #tpu.memory_space<smem>>, %arg3: memref<2xf32, #tpu.memory_space<smem>>, %arg4: memref<8x128xf32, #tpu.memory_space<vmem>>) attributes {dimension_semantics = [#tpu.dimension_semantics<parallel>], iteration_bounds = array<i64: 1>, scalar_prefetch = 0 : i64, scratch_operands = 0 : i64, tpu.core_type = #tpu.core_type<tc>, window_params = [{transform_indices = @transform_0, window_bounds = array<i64: 8, 128>}, {transform_indices = @transform_1, window_bounds = array<i64: 2>}, {transform_indices = @transform_2, window_bounds = array<i64: 2>}, {transform_indices = @transform_3, window_bounds = array<i64: 8, 128>}]} {
    %c0 = arith.constant 0 : index
    %0 = memref.load %arg2[%c0] : memref<2xi32, #tpu.memory_space<smem>>
    %c1 = arith.constant 1 : index
    %1 = memref.load %arg2[%c1] : memref<2xi32, #tpu.memory_space<smem>>
    %c0_0 = arith.constant 0 : index
    %2 = memref.load %arg3[%c0_0] : memref<2xf32, #tpu.memory_space<smem>>
    %c1_1 = arith.constant 1 : index
    %3 = memref.load %arg3[%c1_1] : memref<2xf32, #tpu.memory_space<smem>>
    %c0_2 = arith.constant 0 : index
    %c0_3 = arith.constant 0 : index
    %4 = vector.load %arg1[%c0_2, %c0_3] : memref<8x128xf32, #tpu.memory_space<vmem>>, vector<8x128xf32>
    %5 = tpu.iota {dimensions = array<i32: 1>} : vector<8x128xi32>
    %6 = vector.broadcast %0 : i32 to vector<8x128xi32>
    %7 = arith.cmpi sge, %5, %6 : vector<8x128xi32>
    %8 = vector.broadcast %1 : i32 to vector<8x128xi32>
    %9 = arith.cmpi slt, %5, %8 : vector<8x128xi32>
    %10 = arith.andi %7, %9 : vector<8x128xi1>
    %11 = vector.broadcast %2 : f32 to vector<8x128xf32>
    %12 = arith.mulf %11, %4 : vector<8x128xf32>
    %13 = vector.broadcast %3 : f32 to vector<8x128xf32>
    %14 = arith.addf %12, %13 : vector<8x128xf32>
    %15 = arith.select %10, %14, %4 : vector<8x128xi1>, vector<8x128xf32>
    %c0_4 = arith.constant 0 : index
    %c0_5 = arith.constant 0 : index
    %16 = vector.load %arg4[%c0_4, %c0_5] : memref<8x128xf32, #tpu.memory_space<vmem>>, vector<8x128xf32>
    tpu.vector_store %arg4[%c0_4, %c0_5], %15 {strides = array<i32>} : memref<8x128xf32, #tpu.memory_space<vmem>>, vector<8x128xf32>,
    return
  }
  func.func @transform_0(%arg0: i32) -> (i32, i32) {
    %c0_i32 = arith.constant 0 : i32
    %c0_i32_0 = arith.constant 0 : i32
    return %arg0, %c0_i32 : i32, i32
  }
  func.func @transform_1(%arg0: i32) -> i32 {
    %c0_i32 = arith.constant 0 : i32
    %c0_i32_0 = arith.constant 0 : i32
    return %c0_i32 : i32
  }
  func.func @transform_2(%arg0: i32) -> i32 {
    %c0_i32 = arith.constant 0 : i32
    %c0_i32_0 = arith.constant 0 : i32
    return %c0_i32 : i32
  }
  func.func @transform_3(%arg0: i32) -> (i32, i32) {
    %c0_i32 = arith.constant 0 : i32
    %c0_i32_0 = arith.constant 0 : i32
    return %arg0, %c0_i32 : i32, i32
  }
}

</mosaic_0001>

<bundles_post_ra>
// kernel: bias_layer_forward.1
= control target key start
LH: loop header
LB: loop body
LE: loop exit
PB: predicated region body
PF: predicated region fallthrough
CT: control target
= control target key end

     0   :  { %8 = vsyncpa [#allocation4], 0  ;;  %s175_s0 = inlined_call_operand.vmem [shape: f32[8,128], index: 0, kind: input, shape index: {}]   ;;  %s176_s1 = inlined_call_operand.vmem [shape: s32[2], index: 1, kind: input, shape index: {}]   ;;  %s177_s2 = inlined_call_operand.vmem [shape: f32[2], index: 2, kind: input, shape index: {}]   ;;  %s178_s3 = inlined_call_operand.hbm [shape: f32[8,128], index: 3, kind: output, shape index: {}]  }
   0x1   :  { %9 = vsyncpa [#allocation6], 0 }
   0x2   :  { %10 = vsyncpa [#allocation3], 0  ;;  %s19_s14 = sshll.u32 %s176_s1, 4  ;;  %s29_s17 = sshll.u32 %s177_s2, 4  ;;  %s20_s14 = int_to_ptr.vmem [resolvable:$true] %s19_s14  ;;  %s30_s17 = int_to_ptr.vmem [resolvable:$true] %s29_s17 }
   0x3   :  { %s79_s18 = scalar_lea.vmem %s20_s14, 16  ;;  %p84_p1 = scmp.lt.s32.totalorder %s20_s14, %s20_s14 }
   0x4   :  { %p80_p0 = scmp.ne.s32.totalorder %s20_s14, %s79_s18  ;;  %p85_p2 = scmp.lt.s32.totalorder %s79_s18, %s79_s18 }
   0x6   :  { %p86_p3 = por %p85_p2, %p84_p1 }
   0x8   :  { %p87_p4 = pnand %p86_p3, %p80_p0 }
   0xa   :  { %90 = shalt.err (!%p87_p4)
}
   0xb   :  { %s131_s19 = smov [#allocation2]   ;;  %s91_s20 = scalar_lea.vmem %s30_s17, 16 }
   0xc   :  { %22 = dma.vmem_to_smem %s20_s14, 16, %s131_s19, [#allocation4]  }
   0xd   :  { %p92_p5 = scmp.ne.s32.totalorder %s30_s17, %s91_s20  ;;  %p96_p6 = scmp.lt.s32.totalorder %s30_s17, %s30_s17 }
   0xe   :  { %p97_p7 = scmp.lt.s32.totalorder %s91_s20, %s91_s20 }
  0x10   :  { %p98_p8 = por %p97_p7, %p96_p6 }
  0x12   :  { %p99_p9 = pnand %p98_p8, %p92_p5 }
  0x14   :  { %102 = shalt.err (!%p99_p9)
}
  0x15   :  { %s132_s1 = smov [#allocation5]  }
  0x16   :  { %32 = dma.vmem_to_smem %s30_s17, 16, %s132_s1, [#allocation6]  }
  0x17   :  { %125 = dma.done.wait [#allocation4], 16  }
  0x18   :  { %126 = vsyncadd [#allocation4], 4294967280 }
  0x19   :  { %127 = dma.done.wait [#allocation6], 16  }
  0x1a   :  { %128 = vsyncadd [#allocation6], 4294967280 }
  0x1b   :  { %39 = sfence }
  0x1c   :  { %s40_s2 = sld [smem:[#allocation2]]  ;;  %s74_s21 = sld [smem:[#allocation2 + $0x1]]  ;;  %v45_v0 = vlaneseq  ;;  %v44_v2 = vld [vmem:[%s175_s0] sm:$0xff] }
  0x1d   :  { %s42_s22 = sld [smem:[#allocation5]]  ;;  %s75_s23 = sld [smem:[#allocation5 + $0x1]] }
  0x1e   :  { %v46_v1 = vand.u32 127, %v45_v0  ;;  %s133_s26 = smov [#allocation7]  }
  0x1f   :  { %s64_s27 = sshll.u32 %s133_s26, 4  ;;  %s65_s27 = int_to_ptr.vmem [resolvable:$true] %s64_s27 }
  0x20   :  { %s103_s28 = scalar_lea.vmem %s65_s27, 128  ;;  %p108_p11 = scmp.lt.s32.totalorder %s65_s27, %s65_s27 }
  0x21   :  { %p104_p10 = scmp.ne.s32.totalorder %s65_s27, %s103_s28  ;;  %p109_p12 = scmp.lt.s32.totalorder %s103_s28, %s103_s28 }
  0x22   :  { %v47_v3 = vstv %s40_s2  ;;  %v49_v4 = vstv %s74_s21 }
  0x23   :  { %vm48_vm0 = vcmp.ge.s32.totalorder %v46_v1, %v47_v3  ;;  %vm50_vm1 = vcmp.lt.s32.totalorder %v46_v1, %v49_v4  ;;  %v52_v5 = vstv %s42_s22  ;;  %v54_v6 = vstv %s75_s23  ;;  %p110_p13 = por %p109_p12, %p108_p11 }
  0x24   :  { %v53_v7 = vmul.f32 %v52_v5, %v44_v2  ;;  %vm51_vm2 = vmand %vm48_vm0, %vm50_vm1 }
  0x25   :  { %p111_p0 = pnand %p110_p13, %p104_p10 }
  0x26   :  { %v55_v8 = vadd.f32 %v54_v6, %v53_v7 }
  0x28   :  { %v56_v9 = vsel %vm51_vm2, %v55_v8, %v44_v2 }
  0x29   :  { %57 = vst [vmem:[#allocation7] sm:$0xff] %v56_v9 }
  0x2a   :  { %114 = shalt.err (!%p111_p0)
}
  0x2b   :  { %s115_s30 = scalar_lea.hbm %s178_s3, 128 }
  0x2c   :  { %p116_p1 = scmp.ne.s32.totalorder %s178_s3, %s115_s30  ;;  %p119_p2 = scmp.lt.u32.totalorder %s115_s30, %s178_s3 }
  0x2e   :  { %p121_p3 = pnand %p119_p2, %p116_p1 }
  0x30   :  { %124 = shalt.err (!%p121_p3)
}
  0x31   :  { %67 = dma.vmem_to_hbm [thread:$0]  %s65_s27, 128, %s178_s3, [#allocation3]  }
  0x32   :  { %129 = dma.done.wait [#allocation3], 128  }
  0x33   :  { %130 = vsyncadd [#allocation3], 4294967168 }
  0x34   :  { %71 = vsyncpa [#allocation3], 1 }
  0x35   :  { %72 = vsyncpa [#allocation4], 1 }
  0x36   :  { %73 = vsyncpa [#allocation6], 1 }

</bundles_post_ra>
